<compile_context>
chip_gen: v6e
topology: v6e:2x2x1
jax: 0.10.0
libtpu: 0.0.40
codegen_flags: <defaults>
</compile_context>

<pallas_src>
import functools

import jax
import jax.numpy as jnp
from jax.experimental import pallas as pl
from jax.experimental.pallas import tpu as pltpu


def _fused_linear_kernel(x_ref, w_ref, b_ref, o_ref):
    # One MXU dot + one VALU bias add per batch tile.
    acc = jnp.dot(x_ref[...], w_ref[...], preferred_element_type=jnp.float32)
    o_ref[...] = (acc + b_ref[...]).astype(o_ref.dtype)


def _pick_batch_tile(batch, tb):
    tb = max(8, (int(tb) // 8) * 8)               # multiple of 8 (Mosaic sublane rule)
    tb = min(tb, max(8, pl.cdiv(batch, 8) * 8))   # no larger than the padded batch
    if batch >= 16:                               # keep >= 2 grid steps -> both v7x TCs busy
        tb = min(tb, max(8, (batch // 2 // 8) * 8))
    return tb


@functools.partial(jax.jit, static_argnames=("tb",))
def data_parallel_model(x, params, *, tb=2048):
    """x: [B, 10] float32 -> [B, 20] float32 (forward of DataParallelModel)."""
    (w1, b1), (w2, b2), (w3, b3) = params

    # Algebraic fusion of the 3 Linears (no nonlinearity between them):
    #   y = ((x@w1 + b1)@w2 + b2)@w3 + b3  ==  x @ (w1@w2@w3) + ((b1@w2 + b2)@w3 + b3)
    w_fused = w1 @ w2 @ w3                      # (10, 20)
    b_fused = (b1 @ w2 + b2) @ w3 + b3          # (1, 20)
    in_features, out_features = w_fused.shape

    batch = x.shape[0]
    tb = _pick_batch_tile(batch, tb)
    grid = pl.cdiv(batch, tb)                   # ragged last tile OK -> no jnp.pad of x

    cost = pl.CostEstimate(
        flops=2 * batch * in_features * out_features,
        transcendentals=0,
        bytes_accessed=4 * (batch * in_features + batch * out_features
                            + in_features * out_features + out_features),
    )

    return pl.pallas_call(
        _fused_linear_kernel,
        out_shape=jax.ShapeDtypeStruct((batch, out_features), jnp.float32),
        grid=(grid,),
        in_specs=[
            pl.BlockSpec((tb, in_features), lambda i: (i, 0)),            # x batch tile
            pl.BlockSpec((in_features, out_features), lambda i: (0, 0)),  # fused W (VMEM-resident)
            pl.BlockSpec((1, out_features), lambda i: (0, 0)),            # fused b (VMEM-resident)
        ],
        out_specs=pl.BlockSpec((tb, out_features), lambda i: (i, 0)),
        compiler_params=pltpu.CompilerParams(
            dimension_semantics=("parallel",),       # megacore sharding on v7x
            vmem_limit_bytes=32 * 1024 * 1024,       # headroom for large tb on v5e
        ),
        cost_estimate=cost,
    )(x, w_fused, b_fused)


def init_params(key):
    """Deterministic init matching PyTorch nn.Linear shapes.

    PyTorch stores weight as [out, in]; we store the transpose [in, out].
    Init mimics PyTorch's default U(-1/sqrt(fan_in), 1/sqrt(fan_in)).
    """
    def linear(key, fan_in, fan_out):
        kw, kb = jax.random.split(key)
        bound = 1.0 / jnp.sqrt(fan_in)
        w = jax.random.uniform(kw, (fan_in, fan_out), jnp.float32,
                               minval=-bound, maxval=bound)
        b = jax.random.uniform(kb, (1, fan_out), jnp.float32,
                               minval=-bound, maxval=bound)
        return w, b

    k1, k2, k3 = jax.random.split(key, 3)
    return (linear(k1, 10, 20), linear(k2, 20, 20), linear(k3, 20, 20))


def reference(x, params):
    # Unfused reference: mirrors the PyTorch forward layer-by-layer.
    (w1, b1), (w2, b2), (w3, b3) = params
    h = x @ w1 + b1
    h = h @ w2 + b2
    h = h @ w3 + b3
    return h


if __name__ == "__main__":
    key = jax.random.PRNGKey(0)
    kx, kp = jax.random.split(key)

    B = 16
    x = jax.random.normal(kx, (B, 10), dtype=jnp.float32)
    params = init_params(kp)

    # Default tile logic picks tb=8 here (2 grid steps), exercising the pipeline.
    out = data_parallel_model(x, params)
    out = jax.block_until_ready(out)

    ref = reference(x, params)
    assert out.shape == (B, 20), out.shape
    assert jnp.allclose(out, ref, atol=1e-5, rtol=1e-5), \
        float(jnp.max(jnp.abs(out - ref)))

    print("KERNEL_OK")
</pallas_src>

<mosaic_0001>
module attributes {stable_mosaic.version = 11 : i64} {
  func.func @_fused_linear_kernel(%arg0: i32, %arg1: memref<8x10xf32, #tpu.memory_space<vmem>>, %arg2: memref<10x20xf32, #tpu.memory_space<vmem>>, %arg3: memref<1x20xf32, #tpu.memory_space<vmem>>, %arg4: memref<8x20xf32, #tpu.memory_space<vmem>>) attributes {dimension_semantics = [#tpu.dimension_semantics<parallel>], iteration_bounds = array<i64: 2>, scalar_prefetch = 0 : i64, scratch_operands = 0 : i64, tpu.core_type = #tpu.core_type<tc>, window_params = [{transform_indices = @transform_0, window_bounds = array<i64: 8, 10>}, {pipeline_mode = #tpu.pipeline_mode<synchronous>, transform_indices = @transform_1, window_bounds = array<i64: 10, 20>}, {pipeline_mode = #tpu.pipeline_mode<synchronous>, transform_indices = @transform_2, window_bounds = array<i64: 1, 20>}, {transform_indices = @transform_3, window_bounds = array<i64: 8, 20>}]} {
    %c0 = arith.constant 0 : index
    %c0_0 = arith.constant 0 : index
    %0 = vector.load %arg1[%c0, %c0_0] : memref<8x10xf32, #tpu.memory_space<vmem>>, vector<8x10xf32>
    %c0_1 = arith.constant 0 : index
    %c0_2 = arith.constant 0 : index
    %1 = vector.load %arg2[%c0_1, %c0_2] : memref<10x20xf32, #tpu.memory_space<vmem>>, vector<10x20xf32>
    %cst = arith.constant dense<0.000000e+00> : vector<8x20xf32>
    %2 = tpu.matmul %0, %1, %cst {dimension_numbers = #tpu.dot_dimension_numbers<[1], [0], [0], [1], [0, 0, 1, 1], [], []>} : vector<8x10xf32>, vector<10x20xf32>, vector<8x20xf32> -> vector<8x20xf32>
    %c0_3 = arith.constant 0 : index
    %c0_4 = arith.constant 0 : index
    %3 = vector.load %arg3[%c0_3, %c0_4] : memref<1x20xf32, #tpu.memory_space<vmem>>, vector<1x20xf32>
    %4 = vector.broadcast %3 : vector<1x20xf32> to vector<8x20xf32>
    %5 = arith.addf %2, %4 : vector<8x20xf32>
    %c0_5 = arith.constant 0 : index
    %c0_6 = arith.constant 0 : index
    %6 = vector.load %arg4[%c0_5, %c0_6] : memref<8x20xf32, #tpu.memory_space<vmem>>, vector<8x20xf32>
    tpu.vector_store %arg4[%c0_5, %c0_6], %5 {strides = array<i32>} : memref<8x20xf32, #tpu.memory_space<vmem>>, vector<8x20xf32>,
    return
  }
  func.func @transform_0(%arg0: i32) -> (i32, i32) {
    %c0_i32 = arith.constant 0 : i32
    %c0_i32_0 = arith.constant 0 : i32
    return %arg0, %c0_i32 : i32, i32
  }
  func.func @transform_1(%arg0: i32) -> (i32, i32) {
    %c0_i32 = arith.constant 0 : i32
    %c0_i32_0 = arith.constant 0 : i32
    %c0_i32_1 = arith.constant 0 : i32
    return %c0_i32, %c0_i32_0 : i32, i32
  }
  func.func @transform_2(%arg0: i32) -> (i32, i32) {
    %c0_i32 = arith.constant 0 : i32
    %c0_i32_0 = arith.constant 0 : i32
    %c0_i32_1 = arith.constant 0 : i32
    return %c0_i32, %c0_i32_0 : i32, i32
  }
  func.func @transform_3(%arg0: i32) -> (i32, i32) {
    %c0_i32 = arith.constant 0 : i32
    %c0_i32_0 = arith.constant 0 : i32
    return %arg0, %c0_i32 : i32, i32
  }
}

</mosaic_0001>

<bundles_post_ra>
// kernel: data_parallel_model.1
= control target key start
LH: loop header
LB: loop body
LE: loop exit
PB: predicated region body
PF: predicated region fallthrough
CT: control target
= control target key end

     0   :  { %8 = vsyncpa [#allocation3], 0  ;;  %s580_s0 = inlined_call_operand.vmem [shape: f32[16,10], index: 0, kind: input, shape index: {}]   ;;  %s581_s1 = inlined_call_operand.vmem [shape: f32[10,20], index: 1, kind: input, shape index: {}]   ;;  %s582_s2 = inlined_call_operand.vmem [shape: f32[1,20], index: 2, kind: input, shape index: {}]   ;;  %s583_s3 = inlined_call_operand.hbm [shape: f32[16,20], index: 3, kind: output, shape index: {}]  }
   0x1   :  { %10 = vsyncpa [#allocation3 + $0x1], 0  ;;  %s478_s12 = smov 0   ;;  %s480_s13 = smov 0  }
   0x2   :  { %s482_s14 = smov 0   ;;  %s484_s15 = smov 0  }
   0x3 LB: > { %s499_s16 = sadd.s32 4294967295, %s453_s15   ;;  %s329_s17 = sadd.s32 4294967294, %s453_s15   ;;  %s453_s15 = sphi %s484_s15, %s589_s15   ;;  %s449_s14 = sphi %s482_s14, %s588_s14   ;;  %s445_s13 = sphi %s480_s13, %s587_s13   ;;  %s441_s12 = sphi %s478_s12, %s586_s12  }
   0x4   : > { %s503_s18 = sadd.s32 1, %s453_s15   ;;  %s91_s19 = sadd.s32 1, %s449_s14 }
   0x5   : > { %s88_s20 = ssub.s32 %s453_s15, %s503_s18  ;;  %p101_p0 = scmp.ne.s32.totalorder %s449_s14, %s445_s13 }
   0x6   : > { %p89_p1 = scmp.eq.s32.totalorder %s88_s20, 0  ;;  %p102_p2 = scmp.eq.s32.totalorder %s499_s16, 1 }
   0x7   : > { %p107_p3 = scmp.ne.s32.totalorder %s445_s13, %s441_s12  ;;  %p108_p4 = scmp.eq.s32.totalorder %s329_s17, 1 }
   0x8   : > { %s514_s21 = scalar_select %p89_p1, %s449_s14, %s91_s19  }
   0x9   : > { %p516_p5 = por %p102_p2, %p101_p0  ;;  %p520_p6 = por %p108_p4, %p107_p3 }
   0xa   : > { %p332_p7 = scmp.ge.s32.totalorder %s453_s15, 1  ;;  %p139_p8 = scmp.lt.s32.totalorder %s453_s15, 3 }
   0xc   : > { %p140_p9 = pnand %p332_p7, %p139_p8 }
   0xd   : > { %p162_p10 = scmp.lt.s32.totalorder (!%p140_p9), %s499_s16, 1  ;;  %s159_s6 = sand.u32 (!%p140_p9), 1, %s445_s13  }
   0xe   : > { %143 = sbr.rel (%p140_p9) target bundleno = 233 (0xe9), region = 32  ;;  %s333_s7 = sshll.u32 (!%p140_p9), %s159_s6, 3 }
   0xf   : > { %s339_s10 = sshll.u32 (!%p140_p9), %s499_s16, 7  ;;  %s161_s11 = scalar_lea.vmem (!%p140_p9), [#allocation2], %s333_s7 }
  0x10   : > { %s270_s17 = sshll.u32 (!%p140_p9), %s161_s11, 4  ;;  %s545_s24 = scalar_lea.hbm (!%p140_p9), %s583_s3, %s339_s10  ;;  %s271_s17 = int_to_ptr.vmem [resolvable:$true] %s270_s17 }
  0x11   : > { %s257_s25 = scalar_lea.sflag (!%p140_p9), [#allocation3], %s159_s6  ;;  %s393_s26 = scalar_lea.vmem (!%p140_p9), %s271_s17, 128 }
  0x12   : > { %p394_p11 = scmp.ne.s32.totalorder (!%p140_p9), %s271_s17, %s393_s26 }
  0x13   : > { %v168_v0 = vld [vmem:[%s581_s1 + $0x8] sm:$0x3]  ;;  %vm180_vm0 = vcmask 1041408   ;;  %v455_v1 = vmov 0.0   ;;  %v167_v2 = vld [vmem:[%s581_s1] sm:$0xff]  ;;  %vm456_vm1 = vmmov 0  }
  0x14   : > { %345 = vmatprep.subr.mxu0 %v455_v1  ;;  %349 = vmatprep.mubr.msk.f32.mxu0 %vm456_vm1, %v455_v1  ;;  %s163_s28 = scalar_select %p162_p10, %s499_s16, 1  ;;  %vm176_vm2 = vcmask 80896   ;;  %v335_v4 = vld [vmem:[%s582_s2] ss:$0 sm:$0xff]  ;;  %vm254_vm3 = vcmask 162816  }
  0x15   : > { %346 = vmatpush3.msk.msra.mxu0 %vm180_vm0, %v168_v0  ;;  %p395_p12 = pnand %p394_p11, %p516_p5  ;;  %s457_s16 = smov [#allocation2]  }
  0x16   : > { %347 = vmatprep.subr.mxu0 %v455_v1  ;;  %s334_s29 = sshll.u32 %s163_s28, 3  ;;  %s397_s27 = sshll.u32 %s457_s16, 4  ;;  %s398_s27 = int_to_ptr.vmem [resolvable:$false] %s397_s27 }
  0x17   : > { %348 = vmatpush3.msra.mxu0 %v167_v2  ;;  %s165_s5 = scalar_lea.vmem %s580_s0, %s334_s29  ;;  %p396_p13 = pneg %p395_p12 }
  0x18   : > { %v166_v3 = vld [vmem:[%s165_s5] sm:$0xff]  ;;  %s399_s28 = scalar_lea.vmem %s398_s27, 256  ;;  %p400_p0 = scmp.lt.s32.totalorder %s271_s17, %s398_s27 }
  0x19   : > { %350 = vmatmul.mubr.msk.f32.vlgmr.msra.gmra.mxu0 %vm176_vm2, %v166_v3  ;;  %p401_p1 = scmp.lt.s32.totalorder %s399_s28, %s393_s26 }
  0x1b   : > { %p402_p2 = por %p401_p1, %p400_p0 }
  0x1d   : > { %p403_p3 = pnand %p402_p2, %p396_p13 }
  0xd9   : > { %v250_v5 = vpop.f32.mrf.mxu0 }
  0xda   : > { %v251_v6 = vadd.f32 %v335_v4, %v250_v5 }
  0xdb   : > { %v351_v7 = vpop.f32.mrf.mxu0 }
  0xdc   : > { %255 = vst.msk [vmem:[%s161_s11] sm:$0xff] %vm254_vm3, %v251_v6 }
  0xdd   : > { %406 = shalt.err (!%p403_p3)
}
  0xde   : > { %s407_s29 = scalar_lea.hbm %s545_s24, 128  ;;  %s411_s5 = scalar_lea.hbm %s583_s3, 256 }
  0xdf   : > { %p408_p4 = scmp.ne.s32.totalorder %s545_s24, %s407_s29  ;;  %p412_p9 = scmp.lt.s32.totalorder %s545_s24, %s583_s3 }
  0xe0   : > { %p413_p10 = scmp.lt.s32.totalorder %s411_s5, %s407_s29 }
  0xe1   : > { %p409_p7 = pnand %p408_p4, %p516_p5 }
  0xe2   : > { %p414_p11 = por %p413_p10, %p412_p9 }
  0xe3   : > { %p410_p8 = pneg %p409_p7 }
  0xe5   : > { %p415_p12 = pnand %p414_p11, %p410_p8 }
  0xe7   : > { %418 = shalt.err (!%p415_p12)
}
  0xe8   : > { %352 = dma.vmem_to_hbm [thread:$0]  (%p516_p5), %s271_s17, 128, %s545_s24, %s257_s25  }
  0xe9 PF: > { %p358_p13 = scmp.ge.s32.totalorder %s453_s15, 2  ;;  %s282_s8 = sand.u32 1, %s441_s12  }
  0xea   : > { %s283_s9 = scalar_lea.sflag [#allocation3], %s282_s8 }
  0xeb   : > { %p355_p0 = pnand %p358_p13, %p520_p6 }
  0xed   : > { %p356_p1 = pneg %p355_p0 }
  0xef   : > { %436 = dma.done.wait (%p356_p1), %s283_s9, 128  }
  0xf0   : > { %438 = vsyncadd (%p356_p1), %s283_s9, 4294967168  ;;  %p13_p2 = scmp.ge.s32.totalorder %s503_s18, 4   ;;  %s586_s12 = smov %s445_s13 }
  0xf1   : > { %s587_s13 = smov %s449_s14  ;;  %s588_s14 = smov %s514_s21 }
  0xf2   : > { %s589_s15 = smov %s503_s18  ;;  %15 = sbr.rel (!%p13_p2) target bundleno = 3 (0x3), region = 67 }
  0xf7   :  { %288 = vsyncpa [#allocation3], 1 }
  0xf8   :  { %290 = vsyncpa [#allocation3 + $0x1], 1 }

</bundles_post_ra>
